<compile_context>
chip_gen: v5e
topology: v5e:2x2
jax: 0.10.0
libtpu: 0.0.40
codegen_flags: <defaults>
</compile_context>

<pallas_src>
import jax
import jax.numpy as jnp
from jax.experimental import pallas as pl
from jax.experimental.pallas import tpu as pltpu


def _round_up(n, m):
    return (n + m - 1) // m * m


def highway(x, w_proj, b_proj, w_trans, b_trans, *, tm=None, tn=None,
            matmul_dtype=jnp.bfloat16):
    """Highway layer forward.

    x:        (N, H)
    w_proj:   (H, H) laid out (in, out)  -> x @ w_proj
    b_proj:   (H,)
    w_trans:  (H, H) laid out (in, out)
    b_trans:  (H,)
    """
    N, H = x.shape
    out_dtype = x.dtype

    # ---- tile sizes & lane/sublane padding --------------------------------
    H_pad = _round_up(max(H, 128), 128)          # lane-dense feature axis
    N8 = _round_up(max(N, 8), 8)
    if tm is None:
        tm = min(512, N8)                        # real row tile (pipelining)
    tm = _round_up(tm, 8)
    N_pad = _round_up(N8, tm)

    if tn is None:
        tn = min(512, H_pad)                     # feature-axis column tile
    tn = _round_up(tn, 128)
    while H_pad % tn:                            # tn must divide H_pad
        tn -= 128
    nc = H_pad // tn

    # ---- zero-pad inputs / params (padding sliced off at the end) ---------
    x_p = jnp.zeros((N_pad, H_pad), x.dtype).at[:N, :H].set(x)
    wp = jnp.zeros((H_pad, H_pad), jnp.float32).at[:H, :H].set(w_proj)
    wt = jnp.zeros((H_pad, H_pad), jnp.float32).at[:H, :H].set(w_trans)
    bp = jnp.zeros((H_pad,), jnp.float32).at[:H].set(b_proj)
    bt = jnp.zeros((H_pad,), jnp.float32).at[:H].set(b_trans)

    # ---- fuse proj/transform into a single per-column-tile weight ---------
    # w_fused[j] = [ Wp[:, j*tn:(j+1)*tn] | Wt[:, j*tn:(j+1)*tn] ]  (H_pad, 2*tn)
    wp_t = wp.reshape(H_pad, nc, tn).transpose(1, 0, 2)
    wt_t = wt.reshape(H_pad, nc, tn).transpose(1, 0, 2)
    w_fused = jnp.concatenate([wp_t, wt_t], axis=-1).astype(matmul_dtype)  # (nc, H_pad, 2*tn)
    b_fused = jnp.concatenate(
        [bp.reshape(nc, 1, tn), bt.reshape(nc, 1, tn)], axis=-1
    ).astype(jnp.float32)                                                  # (nc, 1, 2*tn)

    grid = (N_pad // tm, nc)

    def kernel(x_ref, w_ref, b_ref, o_ref):
        j = pl.program_id(1)
        x_tile = x_ref[...]                                  # (tm, H_pad), f32
        w = w_ref[0]                                         # (H_pad, 2*tn), matmul dtype
        b = b_ref[0]                                         # (1, 2*tn), f32

        # one fused MXU matmul, f32 accumulation
        y = jnp.dot(x_tile.astype(w.dtype), w,
                    preferred_element_type=jnp.float32) + b  # (tm, 2*tn)

        proj = jnp.maximum(y[:, :tn], 0.0)                   # ReLU
        gate = jnp.maximum(y[:, tn:], 0.0)                   # ReLU

        # matching x column tile for the residual term (full precision)
        col0 = pl.multiple_of(j * tn, 128)
        x_cols = x_ref[:, pl.ds(col0, tn)].astype(jnp.float32)

        # gate*proj + (1-gate)*x  ==  x + gate*(proj - x)
        o_ref[...] = (x_cols + gate * (proj - x_cols)).astype(o_ref.dtype)

    out = pl.pallas_call(
        kernel,
        out_shape=jax.ShapeDtypeStruct((N_pad, H_pad), out_dtype),
        grid_spec=pltpu.PrefetchScalarGridSpec(
            num_scalar_prefetch=0,
            grid=grid,
            in_specs=[
                pl.BlockSpec((tm, H_pad), lambda i, j: (i, 0)),        # x row tile
                pl.BlockSpec((1, H_pad, 2 * tn), lambda i, j: (j, 0, 0)),  # fused W tile
                pl.BlockSpec((1, 1, 2 * tn), lambda i, j: (j, 0, 0)),      # fused bias tile
            ],
            out_specs=pl.BlockSpec((tm, tn), lambda i, j: (i, j)),
        ),
        compiler_params=pltpu.CompilerParams(
            dimension_semantics=("parallel", "parallel"),
            vmem_limit_bytes=48 * 1024 * 1024,
        ),
    )(x_p, w_fused, b_fused)

    return out[:N, :H]


def highway_ref(x, w_proj, b_proj, w_trans, b_trans):
    proj = jnp.maximum(x @ w_proj + b_proj, 0.0)
    gate = jnp.maximum(x @ w_trans + b_trans, 0.0)
    return gate * proj + (1.0 - gate) * x


if __name__ == "__main__":
    key = jax.random.PRNGKey(0)
    k_x, k_wp, k_bp, k_wt, k_x2, k_wp2, k_bp2, k_wt2 = jax.random.split(key, 8)

    # ---- small module-consistent shapes (batch rows, input_size) ----------
    N, H = 8, 32
    x = jax.random.normal(k_x, (N, H), dtype=jnp.float32)

    bound = 1.0 / jnp.sqrt(H)
    w_proj = jax.random.uniform(k_wp, (H, H), jnp.float32, -bound, bound)   # (in, out)
    b_proj = jax.random.uniform(k_bp, (H,), jnp.float32, -bound, bound)
    w_trans = jax.random.uniform(k_wt, (H, H), jnp.float32, -bound, bound)  # (in, out)
    b_trans = jnp.full((H,), -2.0, dtype=jnp.float32)                       # .fill_(-2.0)

    expected = highway_ref(x, w_proj, b_proj, w_trans, b_trans)

    # f32 MXU path: tight check
    out_f32 = jax.block_until_ready(
        highway(x, w_proj, b_proj, w_trans, b_trans, matmul_dtype=jnp.float32))
    assert out_f32.shape == (N, H)
    assert jnp.allclose(out_f32, expected, atol=1e-5, rtol=1e-5)

    # bf16 MXU path (default): looser tolerance due to input rounding
    out_bf16 = jax.block_until_ready(highway(x, w_proj, b_proj, w_trans, b_trans))
    assert out_bf16.shape == (N, H)
    assert jnp.allclose(out_bf16, expected, atol=5e-2, rtol=5e-2)

    # ---- exercise a multi-tile grid (2 row tiles x 2 column tiles) --------
    N2, H2 = 24, 256
    x2 = jax.random.normal(k_x2, (N2, H2), dtype=jnp.float32)
    bound2 = 1.0 / jnp.sqrt(H2)
    w_proj2 = jax.random.uniform(k_wp2, (H2, H2), jnp.float32, -bound2, bound2)
    b_proj2 = jax.random.uniform(k_bp2, (H2,), jnp.float32, -bound2, bound2)
    w_trans2 = jax.random.uniform(k_wt2, (H2, H2), jnp.float32, -bound2, bound2)
    b_trans2 = jnp.full((H2,), -2.0, dtype=jnp.float32)

    out2 = jax.block_until_ready(
        highway(x2, w_proj2, b_proj2, w_trans2, b_trans2,
                tm=16, tn=128, matmul_dtype=jnp.float32))
    expected2 = highway_ref(x2, w_proj2, b_proj2, w_trans2, b_trans2)
    assert out2.shape == (N2, H2)
    assert jnp.allclose(out2, expected2, atol=1e-4, rtol=1e-4)

    print("KERNEL_OK")
</pallas_src>

<mosaic_0001>
module attributes {stable_mosaic.version = 11 : i64} {
  func.func @kernel(%arg0: i32, %arg1: i32, %arg2: memref<8x128xf32, #tpu.memory_space<vmem>>, %arg3: memref<1x128x256xf32, #tpu.memory_space<vmem>>, %arg4: memref<1x1x256xf32, #tpu.memory_space<vmem>>, %arg5: memref<8x128xf32, #tpu.memory_space<vmem>>) attributes {dimension_semantics = [#tpu.dimension_semantics<parallel>, #tpu.dimension_semantics<parallel>], iteration_bounds = array<i64: 1, 1>, scalar_prefetch = 0 : i64, scratch_operands = 0 : i64, tpu.core_type = #tpu.core_type<tc>, window_params = [{transform_indices = @transform_0, window_bounds = array<i64: 8, 128>}, {transform_indices = @transform_1, window_bounds = array<i64: 1, 128, 256>}, {transform_indices = @transform_2, window_bounds = array<i64: 1, 1, 256>}, {transform_indices = @transform_3, window_bounds = array<i64: 8, 128>}]} {
    %c0 = arith.constant 0 : index
    %c0_0 = arith.constant 0 : index
    %0 = vector.load %arg2[%c0, %c0_0] : memref<8x128xf32, #tpu.memory_space<vmem>>, vector<8x128xf32>
    %c0_1 = arith.constant 0 : index
    %c0_2 = arith.constant 0 : index
    %c0_3 = arith.constant 0 : index
    %1 = vector.load %arg3[%c0_1, %c0_2, %c0_3] : memref<1x128x256xf32, #tpu.memory_space<vmem>>, vector<1x128x256xf32>
    %2 = vector.shape_cast %1 : vector<1x128x256xf32> to vector<128x256xf32>
    %c0_4 = arith.constant 0 : index
    %c0_5 = arith.constant 0 : index
    %c0_6 = arith.constant 0 : index
    %3 = vector.load %arg4[%c0_4, %c0_5, %c0_6] : memref<1x1x256xf32, #tpu.memory_space<vmem>>, vector<1x1x256xf32>
    %4 = vector.shape_cast %3 : vector<1x1x256xf32> to vector<1x256xf32>
    %cst = arith.constant dense<0.000000e+00> : vector<8x256xf32>
    %5 = tpu.matmul %0, %2, %cst {dimension_numbers = #tpu.dot_dimension_numbers<[1], [0], [0], [1], [0, 0, 1, 1], [], []>} : vector<8x128xf32>, vector<128x256xf32>, vector<8x256xf32> -> vector<8x256xf32>
    %6 = vector.broadcast %4 : vector<1x256xf32> to vector<8x256xf32>
    %7 = arith.addf %5, %6 : vector<8x256xf32>
    %8 = vector.extract_strided_slice %7 {offsets = [0, 0], sizes = [8, 128], strides = [1, 1]} : vector<8x256xf32> to vector<8x128xf32>
    %cst_7 = arith.constant 0.000000e+00 : f32
    %9 = vector.broadcast %cst_7 : f32 to vector<8x128xf32>
    %10 = arith.maximumf %8, %9 : vector<8x128xf32>
    %11 = vector.extract_strided_slice %7 {offsets = [0, 128], sizes = [8, 128], strides = [1, 1]} : vector<8x256xf32> to vector<8x128xf32>
    %cst_8 = arith.constant 0.000000e+00 : f32
    %12 = vector.broadcast %cst_8 : f32 to vector<8x128xf32>
    %13 = arith.maximumf %11, %12 : vector<8x128xf32>
    %c128_i32 = arith.constant 128 : i32
    %14 = arith.muli %arg1, %c128_i32 : i32
    %15 = tpu.assume_multiple %14, 128 : i32
    %c0_9 = arith.constant 0 : index
    %16 = arith.index_cast %15 : i32 to index
    %17 = vector.load %arg2[%c0_9, %16] : memref<8x128xf32, #tpu.memory_space<vmem>>, vector<8x128xf32>
    %18 = arith.subf %10, %17 : vector<8x128xf32>
    %19 = arith.mulf %13, %18 : vector<8x128xf32>
    %20 = arith.addf %17, %19 : vector<8x128xf32>
    %c0_10 = arith.constant 0 : index
    %c0_11 = arith.constant 0 : index
    %21 = vector.load %arg5[%c0_10, %c0_11] : memref<8x128xf32, #tpu.memory_space<vmem>>, vector<8x128xf32>
    tpu.vector_store %arg5[%c0_10, %c0_11], %20 {strides = array<i32>} : memref<8x128xf32, #tpu.memory_space<vmem>>, vector<8x128xf32>,
    return
  }
  func.func @transform_0(%arg0: i32, %arg1: i32) -> (i32, i32) {
    %c0_i32 = arith.constant 0 : i32
    %c0_i32_0 = arith.constant 0 : i32
    return %arg0, %c0_i32 : i32, i32
  }
  func.func @transform_1(%arg0: i32, %arg1: i32) -> (i32, i32, i32) {
    %c0_i32 = arith.constant 0 : i32
    %c0_i32_0 = arith.constant 0 : i32
    %c0_i32_1 = arith.constant 0 : i32
    return %arg1, %c0_i32, %c0_i32_0 : i32, i32, i32
  }
  func.func @transform_2(%arg0: i32, %arg1: i32) -> (i32, i32, i32) {
    %c0_i32 = arith.constant 0 : i32
    %c0_i32_0 = arith.constant 0 : i32
    %c0_i32_1 = arith.constant 0 : i32
    return %arg1, %c0_i32, %c0_i32_0 : i32, i32, i32
  }
  func.func @transform_3(%arg0: i32, %arg1: i32) -> (i32, i32) {
    %c0_i32 = arith.constant 0 : i32
    return %arg0, %arg1 : i32, i32
  }
}

</mosaic_0001>

<bundles_post_ra>
// kernel: tpu_custom_call.1
= control target key start
LH: loop header
LB: loop body
LE: loop exit
PB: predicated region body
PF: predicated region fallthrough
CT: control target
= control target key end

     0   :  { %8 = vsyncpa [#allocation3], 0  ;;  %s313_s0 = inlined_call_operand.hbm [shape: f32[8,128], index: 0, kind: input, shape index: {}]   ;;  %s314_s1 = inlined_call_operand.hbm [shape: f32[1,128,256], index: 1, kind: input, shape index: {}]   ;;  %s315_s2 = inlined_call_operand.hbm [shape: f32[1,1,256], index: 2, kind: input, shape index: {}]   ;;  %s316_s3 = inlined_call_operand.hbm [shape: f32[8,128], index: 3, kind: output, shape index: {}]  }
   0x1   :  { %9 = vsyncpa [#allocation6], 0  ;;  %s26_s14 = sshll.u32 %s314_s1, 4  ;;  %s27_s14 = int_to_ptr.hbm [resolvable:$true] %s26_s14 }
   0x2   :  { %10 = vsyncpa [#allocation4], 0  ;;  %s275_s15 = smov [#allocation5]   ;;  %s16_s19 = sshll.u32 %s313_s0, 4  ;;  %s17_s19 = int_to_ptr.hbm [resolvable:$true] %s16_s19 }
   0x3   :  { %s28_s16 = sshll.u32 %s275_s15, 4  ;;  %s276_s20 = smov 256   ;;  %s29_s16 = int_to_ptr.vmem [resolvable:$true] %s28_s16 }
   0x4   :  { %s277_s21 = smov 16   ;;  %s278_s22 = smov [#allocation2]  }
   0x5   :  { %34 = dma.hbm_to_vmem [thread:$0]  %s27_s14, 4096, %s29_s16, [#allocation6], %s276_s20, %s276_s20, %s277_s21  }
   0x6   :  { %s18_s23 = sshll.u32 %s278_s22, 4  ;;  %s40_s26 = sshll.u32 %s315_s2, 4  ;;  %s19_s23 = int_to_ptr.vmem [resolvable:$true] %s18_s23  ;;  %s41_s26 = int_to_ptr.hbm [resolvable:$true] %s40_s26 }
   0x7   :  { %21 = dma.hbm_to_vmem [thread:$0]  %s17_s19, 128, %s19_s23, [#allocation3]  }
   0x8   :  { %s279_s1 = smov [#allocation7]  }
   0x9   :  { %s42_s27 = sshll.u32 %s279_s1, 4  ;;  %s43_s27 = int_to_ptr.vmem [resolvable:$true] %s42_s27 }
   0xa   :  { %45 = dma.hbm_to_vmem [thread:$0]  %s41_s26, 32, %s43_s27, [#allocation6]  }
   0xb   :  { %269 = dma.done.wait [#allocation3], 128  }
   0xc   :  { %270 = vsyncadd [#allocation3], 4294967168 }
   0xd   :  { %271 = dma.done.wait [#allocation6], 4128  }
   0xe   :  { %272 = vsyncadd [#allocation6], 4294963168  ;;  %v89_v0 = vld [vmem:[#allocation5 + $0xf0] sm:$0xff]  ;;  %v87_v1 = vld [vmem:[#allocation5 + $0xe0] sm:$0xff]  ;;  %s280_s0 = smov [#allocation8]   ;;  %s155_s30 = sshll.u32 %s316_s3, 4  ;;  %s156_s30 = int_to_ptr.hbm [resolvable:$true] %s155_s30 }
   0xf   :  { %v90_v2 = vld [vmem:[#allocation5 + $0xf8] sm:$0xff]  ;;  %97 = vmatpush.msra.mxu0 %v89_v0  ;;  %v88_v3 = vld [vmem:[#allocation5 + $0xe8] sm:$0xff]  ;;  %v85_v4 = vld [vmem:[#allocation5 + $0xd0] sm:$0xff]  ;;  %s153_s2 = sshll.u32 %s280_s0, 4  ;;  %s154_s2 = int_to_ptr.vmem [resolvable:$true] %s153_s2 }
  0x10   :  { %117 = vmatpush.msra.mxu1 %v90_v2  ;;  %v86_v5 = vld [vmem:[#allocation5 + $0xd8] sm:$0xff]  ;;  %v83_v6 = vld [vmem:[#allocation5 + $0xc0] sm:$0xff]  ;;  %v84_v7 = vld [vmem:[#allocation5 + $0xc8] sm:$0xff] }
  0x11   :  { %98 = vmatpush.msra.mxu0 %v87_v1  ;;  %v81_v8 = vld [vmem:[#allocation5 + $0xb0] sm:$0xff]  ;;  %v82_v9 = vld [vmem:[#allocation5 + $0xb8] sm:$0xff]  ;;  %v79_v10 = vld [vmem:[#allocation5 + $0xa0] sm:$0xff] }
  0x12   :  { %118 = vmatpush.msra.mxu1 %v88_v3  ;;  %v80_v11 = vld [vmem:[#allocation5 + $0xa8] sm:$0xff]  ;;  %v77_v12 = vld [vmem:[#allocation5 + $0x90] sm:$0xff]  ;;  %v78_v13 = vld [vmem:[#allocation5 + $0x98] sm:$0xff] }
  0x13   :  { %99 = vmatpush.msra.mxu0 %v85_v4  ;;  %v75_v14 = vld [vmem:[#allocation5 + $0x80] sm:$0xff]  ;;  %v76_v15 = vld [vmem:[#allocation5 + $0x88] sm:$0xff]  ;;  %v73_v16 = vld [vmem:[#allocation5 + $0x70] sm:$0xff] }
  0x14   :  { %119 = vmatpush.msra.mxu1 %v86_v5  ;;  %v74_v17 = vld [vmem:[#allocation5 + $0x78] sm:$0xff]  ;;  %v71_v18 = vld [vmem:[#allocation5 + $0x60] sm:$0xff]  ;;  %v72_v19 = vld [vmem:[#allocation5 + $0x68] sm:$0xff] }
  0x15   :  { %100 = vmatpush.msra.mxu0 %v83_v6  ;;  %v69_v20 = vld [vmem:[#allocation5 + $0x50] sm:$0xff]  ;;  %v70_v21 = vld [vmem:[#allocation5 + $0x58] sm:$0xff]  ;;  %v67_v22 = vld [vmem:[#allocation5 + $0x40] sm:$0xff] }
  0x16   :  { %120 = vmatpush.msra.mxu1 %v84_v7  ;;  %v68_v23 = vld [vmem:[#allocation5 + $0x48] sm:$0xff]  ;;  %v65_v24 = vld [vmem:[#allocation5 + $0x30] sm:$0xff]  ;;  %v66_v25 = vld [vmem:[#allocation5 + $0x38] sm:$0xff] }
  0x17   :  { %101 = vmatpush.msra.mxu0 %v81_v8  ;;  %v63_v26 = vld [vmem:[#allocation5 + $0x20] sm:$0xff]  ;;  %v64_v27 = vld [vmem:[#allocation5 + $0x28] sm:$0xff]  ;;  %v61_v28 = vld [vmem:[#allocation5 + $0x10] sm:$0xff] }
  0x18   :  { %121 = vmatpush.msra.mxu1 %v82_v9  ;;  %v62_v29 = vld [vmem:[#allocation5 + $0x18] sm:$0xff]  ;;  %v59_v30 = vld [vmem:[#allocation5] sm:$0xff]  ;;  %v60_v31 = vld [vmem:[#allocation5 + $0x8] sm:$0xff] }
  0x19   :  { %102 = vmatpush.msra.mxu0 %v79_v10  ;;  %v58_v32 = vld [vmem:[#allocation2] sm:$0xff]  ;;  %v91_v33 = vld [vmem:[#allocation7] sm:$0x3] }
  0x1a   :  { %122 = vmatpush.msra.mxu1 %v80_v11  ;;  %v93_v34 = vperm.slane %v91_v33, 0  ;;  %v94_v35 = vperm.slane %v91_v33, 1 }
  0x1b   :  { %103 = vmatpush.msra.mxu0 %v77_v12 }
  0x1c   :  { %123 = vmatpush.msra.mxu1 %v78_v13 }
  0x1d   :  { %104 = vmatpush.msra.mxu0 %v75_v14 }
  0x1e   :  { %124 = vmatpush.msra.mxu1 %v76_v15 }
  0x1f   :  { %105 = vmatpush.msra.mxu0 %v73_v16 }
  0x20   :  { %125 = vmatpush.msra.mxu1 %v74_v17 }
  0x21   :  { %106 = vmatpush.msra.mxu0 %v71_v18 }
  0x22   :  { %126 = vmatpush.msra.mxu1 %v72_v19 }
  0x23   :  { %107 = vmatpush.msra.mxu0 %v69_v20 }
  0x24   :  { %127 = vmatpush.msra.mxu1 %v70_v21 }
  0x25   :  { %108 = vmatpush.msra.mxu0 %v67_v22 }
  0x26   :  { %128 = vmatpush.msra.mxu1 %v68_v23 }
  0x27   :  { %109 = vmatpush.msra.mxu0 %v65_v24 }
  0x28   :  { %129 = vmatpush.msra.mxu1 %v66_v25 }
  0x29   :  { %110 = vmatpush.msra.mxu0 %v63_v26 }
  0x2a   :  { %130 = vmatpush.msra.mxu1 %v64_v27 }
  0x2b   :  { %111 = vmatpush.msra.mxu0 %v61_v28 }
  0x2c   :  { %131 = vmatpush.msra.mxu1 %v62_v29 }
  0x2d   :  { %112 = vmatpush.msra.mxu0 %v59_v30 }
  0x2e   :  { %132 = vmatpush.msra.mxu1 %v60_v31  ;;  %113 = vmatmul.f32.vlgmr.msra.gmra.mxu0 %v58_v32 }
  0x2f   :  { %133 = vmatmul.f32.vlgmr.msra.gmra.mxu1 %v58_v32 }
  0xab   :  { %v114_v36 = vpop.f32.mrf.mxu0 }
  0xac   :  { %v134_v37 = vpop.f32.mrf.mxu1  ;;  %v115_v38 = vadd.f32 %v114_v36, %v93_v34 }
  0xad   :  { %v135_v39 = vadd.f32 %v134_v37, %v94_v35 }
  0xae   :  { %v137_v40 = vmax.f32 %v115_v38, 0.0 }
  0xaf   :  { %v138_v41 = vmax.f32 %v135_v39, 0.0 }
  0xb0   :  { %v144_v42 = vsub.f32 %v137_v40, %v58_v32 }
  0xb2   :  { %v145_v43 = vmul.f32 %v144_v42, %v138_v41 }
  0xb4   :  { %v146_v44 = vadd.f32 %v145_v43, %v58_v32 }
  0xb6   :  { %147 = vst [vmem:[#allocation8] sm:$0xff] %v146_v44 }
  0xb7   :  { %158 = dma.vmem_to_hbm [thread:$0]  %s154_s2, 128, %s156_s30, [#allocation4]  }
  0xb8   :  { %273 = dma.done.wait [#allocation4], 128  }
  0xb9   :  { %274 = vsyncadd [#allocation4], 4294967168 }
  0xba   :  { %163 = vsyncpa [#allocation3], 1 }
  0xbb   :  { %164 = vsyncpa [#allocation6], 1 }
  0xbc   :  { %165 = vsyncpa [#allocation4], 1 }

</bundles_post_ra>
